<compile_context>
chip_gen: v6e
topology: v6e:2x2x1
jax: 0.10.0
libtpu: 0.0.40
codegen_flags: <defaults>
</compile_context>

<pallas_src>
import functools

import jax
import jax.numpy as jnp
from jax.experimental import pallas as pl
from jax.experimental.pallas import tpu as pltpu


_BLOCK_TARGET_BYTES = 8 << 20   # ~8 MiB blocks: ~85-90% of HBM roofline, all gens
_VMEM_LIMIT_BYTES = 48 << 20    # 2x(in)+2x(out) 8 MiB blocks + weights; < v7x 64 MiB


def _se_kernel(x_ref, w1t_ref, b1_ref, w2t_ref, b2_ref, o_ref, *, inv_hw, use_mxu):
    # x_ref: (NB, C, HW); w1t_ref: (C, Cr); b1_ref: (1, Cr);
    # w2t_ref: (Cr, C);   b2_ref: (1, C);  o_ref: (NB, C, HW)

    # Global average pool: f32 accumulation fused into the lane-reduction; no
    # full-block f32 temp is kept live across the gate computation.
    pooled = jnp.sum(x_ref[...], axis=-1, dtype=jnp.float32) * inv_hw   # (NB, C)

    w1t = w1t_ref[...]                                                  # (C, Cr)
    w2t = w2t_ref[...]                                                  # (Cr, C)
    b1 = b1_ref[...].astype(jnp.float32)                                # (1, Cr)
    b2 = b2_ref[...].astype(jnp.float32)                                # (1, C)

    # 1x1 conv_reduce: pooled @ W1^T + b1, then relu.
    if use_mxu:
        h = jnp.dot(pooled, w1t, preferred_element_type=jnp.float32)    # (NB, Cr)
    else:
        # Tiny channel counts: cheaper on the VPU than padding out the MXU.
        h = jnp.sum(pooled[:, :, None] * w1t[None, :, :], axis=1)       # (NB, Cr)
    h = jnp.maximum(h + b1, 0.0)

    # 1x1 conv_expand: h @ W2^T + b2, then hard_sigmoid = relu6(x + 3) / 6.
    if use_mxu:
        g = jnp.dot(h, w2t, preferred_element_type=jnp.float32)         # (NB, C)
    else:
        g = jnp.sum(h[:, :, None] * w2t[None, :, :], axis=1)            # (NB, C)
    g = g + b2
    g = jnp.clip(g + 3.0, 0.0, 6.0) * (1.0 / 6.0)

    # Re-read x from VMEM and rescale with the gate in the output dtype — avoids
    # a widened full-block temp (bf16 multiply is VPU-native on v6e/v7x).
    gate = g.astype(o_ref.dtype)[:, :, None]                            # (NB, C, 1)
    o_ref[...] = (x_ref[...] * gate).astype(o_ref.dtype)


def _pick_batch_block(n, per_image_bytes, target_bytes=_BLOCK_TARGET_BYTES):
    """Largest NB with NB * per_image_bytes <= target (>= 1, no divisibility req.)."""
    nb = int(max(1, min(n, target_bytes // max(per_image_bytes, 1))))
    # Keep >= 2 grid steps when possible so both v7x TensorCores get work on the
    # "parallel" axis (irrelevant on single-TC v5e/v6e).
    if n >= 2:
        nb = min(nb, (n + 1) // 2)
    return nb


def squeeze_excite(x_nchw, w1, b1, w2, b2):
    """x_nchw: (N, C, H, W); w1: (Cr, C); b1: (Cr,); w2: (C, Cr); b2: (C,)."""
    N, C, H, W = x_nchw.shape
    Cr = w1.shape[0]
    HW = H * W
    x = x_nchw.reshape(N, C, HW)

    # Pre-transpose conv weights (glue) so the kernel does pooled @ W^T directly.
    w1t = jnp.asarray(w1).T          # (C, Cr)
    w2t = jnp.asarray(w2).T          # (Cr, C)
    b1_2d = jnp.asarray(b1).reshape(1, Cr)
    b2_2d = jnp.asarray(b2).reshape(1, C)

    itemsize = jnp.dtype(x_nchw.dtype).itemsize
    per_image_bytes = C * HW * itemsize
    NB = _pick_batch_block(N, per_image_bytes)
    block = (NB, C, HW)
    grid_n = pl.cdiv(N, NB)          # boundary block masked; rows are independent

    # Tiny SE heads stay on the VPU; real MobileNetV3 sizes go to the MXU.
    use_mxu = (C * Cr) >= 1024

    kernel = functools.partial(_se_kernel, inv_hw=1.0 / HW, use_mxu=use_mxu)

    weight_bytes = int(
        w1t.size * jnp.dtype(w1t.dtype).itemsize
        + w2t.size * jnp.dtype(w2t.dtype).itemsize
        + b1_2d.size * jnp.dtype(b1_2d.dtype).itemsize
        + b2_2d.size * jnp.dtype(b2_2d.dtype).itemsize)
    cost = pl.CostEstimate(
        flops=int(5 * N * C * HW + 4 * N * C * Cr),
        transcendentals=0,
        bytes_accessed=int(2 * N * C * HW * itemsize + weight_bytes))

    out = pl.pallas_call(
        kernel,
        out_shape=jax.ShapeDtypeStruct((N, C, HW), x_nchw.dtype),
        grid_spec=pltpu.PrefetchScalarGridSpec(
            num_scalar_prefetch=0,
            grid=(grid_n,),
            in_specs=[
                pl.BlockSpec(block, lambda n: (n, 0, 0)),
                pl.BlockSpec((C, Cr), lambda n: (0, 0)),   # VMEM-resident weights
                pl.BlockSpec((1, Cr), lambda n: (0, 0)),
                pl.BlockSpec((Cr, C), lambda n: (0, 0)),
                pl.BlockSpec((1, C), lambda n: (0, 0)),
            ],
            out_specs=pl.BlockSpec(block, lambda n: (n, 0, 0)),
        ),
        compiler_params=pltpu.CompilerParams(
            dimension_semantics=("parallel",),
            vmem_limit_bytes=_VMEM_LIMIT_BYTES),
        cost_estimate=cost,
    )(x, w1t, b1_2d, w2t, b2_2d)

    return out.reshape(N, C, H, W)


def squeeze_excite_ref(x, w1, b1, w2, b2):
    """Pure-JAX reference mirroring the PyTorch forward."""
    pooled = jnp.mean(x.astype(jnp.float32), axis=(2, 3))            # (N, C)
    h = pooled @ w1.T + b1                                            # (N, Cr)
    h = jnp.maximum(h, 0.0)
    g = h @ w2.T + b2                                                 # (N, C)
    g = jnp.clip(g + 3.0, 0.0, 6.0) / 6.0
    return (x.astype(jnp.float32) * g[:, :, None, None]).astype(x.dtype)


def _run_case(key, N, C, H, W, Cr, dtype=jnp.float32, atol=1e-4, rtol=1e-4):
    kx, k1, kb1, k2, kb2 = jax.random.split(key, 5)
    x = jax.random.normal(kx, (N, C, H, W), dtype=dtype)
    w1 = jax.random.normal(k1, (Cr, C), dtype=jnp.float32) * 0.5
    b1 = jax.random.normal(kb1, (Cr,), dtype=jnp.float32) * 0.1
    w2 = jax.random.normal(k2, (C, Cr), dtype=jnp.float32) * 0.5
    b2 = jax.random.normal(kb2, (C,), dtype=jnp.float32) * 0.1

    out = jax.block_until_ready(squeeze_excite(x, w1, b1, w2, b2))
    ref = squeeze_excite_ref(x, w1, b1, w2, b2)
    assert out.shape == (N, C, H, W)
    assert jnp.allclose(out.astype(jnp.float32), ref.astype(jnp.float32),
                        atol=atol, rtol=rtol), "mismatch vs reference"


if __name__ == "__main__":
    key = jax.random.PRNGKey(0)
    k_small, k_big, k_bf16 = jax.random.split(key, 3)

    # Module config from the spec: in_chs=4, reduce_chs=2 (VPU path, NB batching).
    _run_case(k_small, N=2, C=4, H=16, W=16, Cr=2)

    # Larger channel count: MXU contraction path, NB > 1, even cdiv grid.
    _run_case(k_big, N=8, C=64, H=16, W=16, Cr=16)

    # bf16 + non-dividing batch: exercises the masked boundary block and the
    # bf16 gate-multiply path (looser tolerance for bf16 output).
    _run_case(k_bf16, N=3, C=64, H=16, W=16, Cr=16,
              dtype=jnp.bfloat16, atol=5e-2, rtol=5e-2)

    print("KERNEL_OK")
</pallas_src>

<mosaic_0001>
module attributes {stable_mosaic.version = 11 : i64} {
  func.func @_se_kernel(%arg0: i32, %arg1: memref<1x4x256xf32, #tpu.memory_space<vmem>>, %arg2: memref<4x2xf32, #tpu.memory_space<vmem>>, %arg3: memref<1x2xf32, #tpu.memory_space<vmem>>, %arg4: memref<2x4xf32, #tpu.memory_space<vmem>>, %arg5: memref<1x4xf32, #tpu.memory_space<vmem>>, %arg6: memref<1x4x256xf32, #tpu.memory_space<vmem>>) attributes {dimension_semantics = [#tpu.dimension_semantics<parallel>], iteration_bounds = array<i64: 2>, scalar_prefetch = 0 : i64, scratch_operands = 0 : i64, tpu.core_type = #tpu.core_type<tc>, window_params = [{transform_indices = @transform_0, window_bounds = array<i64: 1, 4, 256>}, {pipeline_mode = #tpu.pipeline_mode<synchronous>, transform_indices = @transform_1, window_bounds = array<i64: 4, 2>}, {pipeline_mode = #tpu.pipeline_mode<synchronous>, transform_indices = @transform_2, window_bounds = array<i64: 1, 2>}, {pipeline_mode = #tpu.pipeline_mode<synchronous>, transform_indices = @transform_3, window_bounds = array<i64: 2, 4>}, {pipeline_mode = #tpu.pipeline_mode<synchronous>, transform_indices = @transform_4, window_bounds = array<i64: 1, 4>}, {transform_indices = @transform_5, window_bounds = array<i64: 1, 4, 256>}]} {
    %c0 = arith.constant 0 : index
    %c0_0 = arith.constant 0 : index
    %c0_1 = arith.constant 0 : index
    %0 = vector.load %arg1[%c0, %c0_0, %c0_1] : memref<1x4x256xf32, #tpu.memory_space<vmem>>, vector<1x4x256xf32>
    %cst = arith.constant dense<0.000000e+00> : vector<1x4xf32>
    %1 = vector.multi_reduction <add>, %0, %cst [2] : vector<1x4x256xf32> to vector<1x4xf32>
    %cst_2 = arith.constant 3.906250e-03 : f32
    %2 = vector.broadcast %cst_2 : f32 to vector<1x4xf32>
    %3 = arith.mulf %1, %2 : vector<1x4xf32>
    %c0_3 = arith.constant 0 : index
    %c0_4 = arith.constant 0 : index
    %4 = vector.load %arg2[%c0_3, %c0_4] : memref<4x2xf32, #tpu.memory_space<vmem>>, vector<4x2xf32>
    %c0_5 = arith.constant 0 : index
    %c0_6 = arith.constant 0 : index
    %5 = vector.load %arg4[%c0_5, %c0_6] : memref<2x4xf32, #tpu.memory_space<vmem>>, vector<2x4xf32>
    %c0_7 = arith.constant 0 : index
    %c0_8 = arith.constant 0 : index
    %6 = vector.load %arg3[%c0_7, %c0_8] : memref<1x2xf32, #tpu.memory_space<vmem>>, vector<1x2xf32>
    %c0_9 = arith.constant 0 : index
    %c0_10 = arith.constant 0 : index
    %7 = vector.load %arg5[%c0_9, %c0_10] : memref<1x4xf32, #tpu.memory_space<vmem>>, vector<1x4xf32>
    %8 = vector.shape_cast %3 : vector<1x4xf32> to vector<1x4x1xf32>
    %9 = vector.shape_cast %4 : vector<4x2xf32> to vector<1x4x2xf32>
    %10 = vector.broadcast %8 : vector<1x4x1xf32> to vector<1x4x2xf32>
    %11 = arith.mulf %10, %9 : vector<1x4x2xf32>
    %cst_11 = arith.constant dense<0.000000e+00> : vector<1x2xf32>
    %12 = vector.multi_reduction <add>, %11, %cst_11 [1] : vector<1x4x2xf32> to vector<1x2xf32>
    %13 = arith.addf %12, %6 : vector<1x2xf32>
    %cst_12 = arith.constant 0.000000e+00 : f32
    %14 = vector.broadcast %cst_12 : f32 to vector<1x2xf32>
    %15 = arith.maximumf %13, %14 : vector<1x2xf32>
    %16 = vector.shape_cast %15 : vector<1x2xf32> to vector<1x2x1xf32>
    %17 = vector.shape_cast %5 : vector<2x4xf32> to vector<1x2x4xf32>
    %18 = vector.broadcast %16 : vector<1x2x1xf32> to vector<1x2x4xf32>
    %19 = arith.mulf %18, %17 : vector<1x2x4xf32>
    %cst_13 = arith.constant dense<0.000000e+00> : vector<1x4xf32>
    %20 = vector.multi_reduction <add>, %19, %cst_13 [1] : vector<1x2x4xf32> to vector<1x4xf32>
    %21 = arith.addf %20, %7 : vector<1x4xf32>
    %cst_14 = arith.constant 3.000000e+00 : f32
    %22 = vector.broadcast %cst_14 : f32 to vector<1x4xf32>
    %23 = arith.addf %21, %22 : vector<1x4xf32>
    %cst_15 = arith.constant 0.000000e+00 : f32
    %cst_16 = arith.constant 6.000000e+00 : f32
    %24 = vector.broadcast %cst_15 : f32 to vector<1x4xf32>
    %25 = arith.maximumf %24, %23 : vector<1x4xf32>
    %26 = vector.broadcast %cst_16 : f32 to vector<1x4xf32>
    %27 = arith.minimumf %26, %25 : vector<1x4xf32>
    %cst_17 = arith.constant 0.166666672 : f32
    %28 = vector.broadcast %cst_17 : f32 to vector<1x4xf32>
    %29 = arith.mulf %27, %28 : vector<1x4xf32>
    %30 = vector.shape_cast %29 : vector<1x4xf32> to vector<1x4x1xf32>
    %c0_18 = arith.constant 0 : index
    %c0_19 = arith.constant 0 : index
    %c0_20 = arith.constant 0 : index
    %31 = vector.load %arg1[%c0_18, %c0_19, %c0_20] : memref<1x4x256xf32, #tpu.memory_space<vmem>>, vector<1x4x256xf32>
    %32 = vector.broadcast %30 : vector<1x4x1xf32> to vector<1x4x256xf32>
    %33 = arith.mulf %31, %32 : vector<1x4x256xf32>
    %c0_21 = arith.constant 0 : index
    %c0_22 = arith.constant 0 : index
    %c0_23 = arith.constant 0 : index
    %34 = vector.load %arg6[%c0_21, %c0_22, %c0_23] : memref<1x4x256xf32, #tpu.memory_space<vmem>>, vector<1x4x256xf32>
    tpu.vector_store %arg6[%c0_21, %c0_22, %c0_23], %33 {strides = array<i32>} : memref<1x4x256xf32, #tpu.memory_space<vmem>>, vector<1x4x256xf32>,
    return
  }
  func.func @transform_0(%arg0: i32) -> (i32, i32, i32) {
    %c0_i32 = arith.constant 0 : i32
    %c0_i32_0 = arith.constant 0 : i32
    %c0_i32_1 = arith.constant 0 : i32
    return %arg0, %c0_i32, %c0_i32_0 : i32, i32, i32
  }
  func.func @transform_1(%arg0: i32) -> (i32, i32) {
    %c0_i32 = arith.constant 0 : i32
    %c0_i32_0 = arith.constant 0 : i32
    %c0_i32_1 = arith.constant 0 : i32
    return %c0_i32, %c0_i32_0 : i32, i32
  }
  func.func @transform_2(%arg0: i32) -> (i32, i32) {
    %c0_i32 = arith.constant 0 : i32
    %c0_i32_0 = arith.constant 0 : i32
    %c0_i32_1 = arith.constant 0 : i32
    return %c0_i32, %c0_i32_0 : i32, i32
  }
  func.func @transform_3(%arg0: i32) -> (i32, i32) {
    %c0_i32 = arith.constant 0 : i32
    %c0_i32_0 = arith.constant 0 : i32
    %c0_i32_1 = arith.constant 0 : i32
    return %c0_i32, %c0_i32_0 : i32, i32
  }
  func.func @transform_4(%arg0: i32) -> (i32, i32) {
    %c0_i32 = arith.constant 0 : i32
    %c0_i32_0 = arith.constant 0 : i32
    %c0_i32_1 = arith.constant 0 : i32
    return %c0_i32, %c0_i32_0 : i32, i32
  }
  func.func @transform_5(%arg0: i32) -> (i32, i32, i32) {
    %c0_i32 = arith.constant 0 : i32
    %c0_i32_0 = arith.constant 0 : i32
    %c0_i32_1 = arith.constant 0 : i32
    return %arg0, %c0_i32, %c0_i32_0 : i32, i32, i32
  }
}

</mosaic_0001>

<bundles_post_ra>
// kernel: tpu_custom_call.1
= control target key start
LH: loop header
LB: loop body
LE: loop exit
PB: predicated region body
PF: predicated region fallthrough
CT: control target
= control target key end

     0   :  { %10 = vsyncpa [#allocation3], 0  ;;  %s739_s0 = inlined_call_operand.hbm [shape: f32[2,4,256], index: 0, kind: input, shape index: {}]   ;;  %s740_s1 = inlined_call_operand.vmem [shape: f32[4,2], index: 1, kind: input, shape index: {}]   ;;  %s741_s2 = inlined_call_operand.vmem [shape: f32[1,2], index: 2, kind: input, shape index: {}]   ;;  %s742_s3 = inlined_call_operand.vmem [shape: f32[2,4], index: 3, kind: input, shape index: {}]   ;;  %s743_s4 = inlined_call_operand.vmem [shape: f32[1,4], index: 4, kind: input, shape index: {}]   ;;  %s744_s5 = inlined_call_operand.hbm [shape: f32[2,4,256], index: 5, kind: output, shape index: {}]  }
   0x1   :  { %12 = vsyncpa [#allocation3 + $0x1], 0 }
   0x2   :  { %13 = vsyncpa [#allocation4], 0 }
   0x3   :  { %15 = vsyncpa [#allocation4 + $0x1], 0  ;;  %s582_s18 = smov 0   ;;  %s584_s19 = smov 0  }
   0x4   :  { %s586_s20 = smov 0   ;;  %s588_s21 = smov 0  }
   0x5 LB: > { %s603_s22 = sadd.s32 4294967295, %s547_s21   ;;  %s391_s23 = sadd.s32 4294967294, %s547_s21   ;;  %s547_s21 = sphi %s588_s21, %s761_s21   ;;  %s543_s20 = sphi %s586_s20, %s760_s20   ;;  %s539_s19 = sphi %s584_s19, %s759_s19   ;;  %s535_s18 = sphi %s582_s18, %s758_s18  }
   0x6   : > { %s607_s24 = sadd.s32 1, %s547_s21   ;;  %s28_s25 = sadd.s32 1, %s543_s20 }
   0x7   : > { %s25_s26 = ssub.s32 %s547_s21, %s607_s24  ;;  %p35_p0 = scmp.ne.s32.totalorder %s543_s20, %s539_s19 }
   0x8   : > { %p26_p1 = scmp.eq.s32.totalorder %s25_s26, 0  ;;  %p36_p2 = scmp.eq.s32.totalorder %s547_s21, 0 }
   0x9   : > { %p41_p3 = scmp.ne.s32.totalorder %s539_s19, %s535_s18  ;;  %p42_p4 = scmp.eq.s32.totalorder %s603_s22, 0 }
   0xa   : > { %s619_s27 = scalar_select %p26_p1, %s543_s20, %s28_s25  }
   0xb   : > { %p621_p5 = por %p36_p2, %p35_p0  ;;  %p625_p6 = por %p42_p4, %p41_p3 }
   0xc   : > { %p149_p7 = scmp.eq.s32.totalorder %s603_s22, 1  ;;  %p155_p8 = scmp.eq.s32.totalorder %s391_s23, 1 }
   0xd   : > { %s748_s29 = scalar_select %p625_p6, 1, 0 }
   0xe   : > { %p419_p10 = scmp.lt.s32.totalorder %s547_s21, 2  ;;  %p632_p11 = por %p149_p7, %p35_p0 }
   0xf   : > { %p636_p12 = por %p155_p8, %p41_p3  ;;  %s187_s7 = sand.u32 1, %s543_s20  }
  0x10   : > { %s749_s30 = scalar_select %p632_p11, 1, 0 }
  0x11   : > { %s750_s6 = scalar_select %p636_p12, 1, 0 }
  0x12   : > { %s405_s8 = sshll.u32 %s547_s21, 7  ;;  %s394_s9 = sshll.u32 %s187_s7, 3 }
  0x13   : > { %s645_s12 = scalar_lea.hbm %s739_s0, %s405_s8  ;;  %s191_s13 = scalar_lea.vmem [#allocation2], %s394_s9 }
  0x14   : > { %s199_s14 = sshll.u32 %s191_s13, 4  ;;  %p649_p13 = pnand %p419_p10, %p621_p5  ;;  %s653_s14 = int_to_ptr.vmem [resolvable:$true] %s199_s14 }
  0x15   : > { %s188_s16 = scalar_lea.sflag [#allocation3], %s187_s7  ;;  %s455_s17 = scalar_lea.hbm %s645_s12, 128 }
  0x16   : > { %p456_p2 = scmp.ne.s32.totalorder %s645_s12, %s455_s17  ;;  %p457_p3 = pneg %p649_p13 }
  0x17   : > { %s460_s26 = scalar_lea.hbm %s739_s0, 256  ;;  %p461_p5 = scmp.lt.s32.totalorder %s645_s12, %s739_s0 }
  0x18   : > { %p458_p4 = pnand %p457_p3, %p456_p2  ;;  %p462_p8 = scmp.lt.s32.totalorder %s460_s26, %s455_s17 }
  0x1a   : > { %p459_p7 = pneg %p458_p4  ;;  %p463_p10 = por %p462_p8, %p461_p5 }
  0x1c   : > { %p464_p9 = pnand %p463_p10, %p459_p7 }
  0x1e   : > { %467 = shalt.err (!%p464_p9)
}
  0x1f   : > { %s468_s7 = scalar_lea.vmem %s653_s14, 128  ;;  %s549_s9 = smov [#allocation2]  }
  0x20   : > { %p469_p0 = scmp.ne.s32.totalorder %s653_s14, %s468_s7  ;;  %s473_s10 = sshll.u32 %s549_s9, 4  ;;  %s474_s10 = int_to_ptr.vmem [resolvable:$false] %s473_s10 }
  0x21   : > { %s475_s11 = scalar_lea.vmem %s474_s10, 256  ;;  %p476_p4 = scmp.lt.s32.totalorder %s653_s14, %s474_s10 }
  0x22   : > { %p471_p1 = pnand %p469_p0, %p457_p3  ;;  %p477_p12 = scmp.lt.s32.totalorder %s475_s11, %s468_s7 }
  0x24   : > { %p472_p2 = pneg %p471_p1  ;;  %p478_p11 = por %p477_p12, %p476_p4 }
  0x26   : > { %p479_p6 = pnand %p478_p11, %p472_p2 }
  0x28   : > { %482 = shalt.err (!%p479_p6)
}
  0x29   : > { %414 = dma.hbm_to_vmem [thread:$0]  (!%p649_p13), %s645_s12, 128, %s653_s14, %s188_s16  }
  0x2a   : > { %p752_p9 = scmp.lt.s32.totalorder %s547_s21, 3  ;;  %p753_p7 = scmp.ge.s32.totalorder %s547_s21, 1 }
  0x2c   : > { %p205_p0 = pnand %p753_p7, %p752_p9 }
  0x2d   : > { %s680_s13 = sand.u32 (!%p205_p0), 1, %s539_s19   ;;  %p754_p6 = scmp.ne.s32.totalorder (!%p205_p0), %s748_s29, 0 }
  0x2e   : > { %208 = sbr.rel (%p205_p0) target bundleno = 493 (0x1ed), region = 40  ;;  %s398_s17 = sshll.u32 (!%p205_p0), %s680_s13, 3 }
  0x2f   : > { %s211_s23 = scalar_lea.sflag (!%p205_p0), [#allocation3], %s680_s13  ;;  %s214_s15 = scalar_lea.vmem (!%p205_p0), [#allocation2], %s398_s17 }
  0x33   : > { %526 = dma.done.wait (%p754_p6), %s211_s23, 128  }
  0x34   : > { %528 = vsyncadd (%p754_p6), %s211_s23, 4294967168  ;;  %vm245_vm0 = vcmask 1043456   ;;  %v241_v0 = vld [vmem:[%s214_s15] sm:$0xff]  ;;  %vm257_vm1 = vcmask 11264   ;;  %v267_v13 = vlaneseq  ;;  %vm275_vm2 = vcmask 25600   ;;  %s406_s7 = sshll.u32 %s603_s22, 7 }
  0x35   : > { %v243_v1 = vcombine.high %v241_v0, %v241_v0  ;;  %v246_v2 = vsel %vm245_vm0, %v241_v0, 0.0  ;;  %v252_v5 = vld [vmem:[%s740_s1] sm:$0xf]  ;;  %v550_v40 = vmov 839922192   ;;  %s240_s9 = scalar_lea.vmem [#allocation5], %s398_s17  ;;  %s319_s15 = scalar_lea.hbm %s744_s5, %s406_s7 }
  0x36   : > { %v268_v16 = vshrl.u32 %v267_v13, 7  ;;  %v254_v17 = vld [vmem:[%s741_s2] sm:$0x1]  ;;  %v297_v41 = vunpack.c.l.s4 %v550_v40  ;;  %s321_s10 = sshll.u32 %s240_s9, 4  ;;  %s307_s12 = scalar_lea.sflag [#allocation4], %s680_s13  ;;  %s322_s10 = int_to_ptr.vmem [resolvable:$true] %s321_s10 }
  0x37   : > { %v247_v3 = vsel %vm245_vm0, %v243_v1, 0.0  ;;  %v253_v23 = vld [vmem:[%s742_s3] sm:$0x3]  ;;  %s483_s14 = scalar_lea.vmem %s322_s10, 128  ;;  %p755_p12 = scmp.ne.s32.totalorder %s749_s30, 0 }
  0x38   : > { %v248_v4 = vadd.f32 %v247_v3, %v246_v2  ;;  %v269_v20 = vsub.s32 0, %v268_v16  ;;  %v255_v32 = vld [vmem:[%s743_s4] sm:$0x1]  ;;  %v298_v42 = vunpack.c.0.s8 %v297_v41  ;;  %p484_p11 = scmp.ne.s32.totalorder %s322_s10, %s483_s14  ;;  %s551_s29 = smov [#allocation5]  }
  0x39   : > { %s487_s16 = sshll.u32 %s551_s29, 4  ;;  %s488_s16 = int_to_ptr.vmem [resolvable:$false] %s487_s16 }
  0x3a   : > { %249 = vadd.xlane.f32.xlu0 %v248_v4  ;;  %v301_v43 = vsub.s32 %v298_v42, %v268_v16  ;;  %p485_p13 = pnand %p484_p11, %p755_p12  ;;  %s489_s22 = scalar_lea.vmem %s488_s16, 256 }
  0x3b   : > { %p490_p3 = scmp.lt.s32.totalorder %s322_s10, %s488_s16  ;;  %p491_p5 = scmp.lt.s32.totalorder %s489_s22, %s483_s14 }
  0x3c   : > { %p486_p1 = pneg %p485_p13 }
  0x3d   : > { %p492_p8 = por %p491_p5, %p490_p3 }
  0x3f   : > { %p493_p10 = pnand %p492_p8, %p486_p1 }
  0xc3   : > { %v250_v6 = vpop.xlane.xlu0 %249 }
  0xc4   : > { %v251_v7 = vmul.f32 0.00390625, %v250_v6 }
  0xc6   : > { %v256_v8 = vmul.f32 %v252_v5, %v251_v7 }
  0xc8   : > { %v258_v9 = vsel %vm257_vm1, %v256_v8, 0.0 }
  0xc9   : > { %v259_v10 = vrot.slane %v258_v9, 4 }
  0xcb   : > { %v260_v11 = vadd.f32 %v259_v10, %v258_v9 }
  0xcd   : > { %v261_v12 = vrot.slane %v260_v11, 2 }
  0xcf   : > { %v262_v14 = vadd.f32 %v261_v12, %v260_v11 }
  0xd1   : > { %v263_v15 = vrot.slane %v262_v14, 1 }
  0xd3   : > { %v264_v18 = vadd.f32 %v263_v15, %v262_v14 }
  0xd5   : > { %v265_v19 = vadd.f32 %v264_v18, %v254_v17 }
  0xd7   : > { %v266_v21 = vmax.f32 %v265_v19, 0.0 }
  0xd9   : > { %v270_v22 = vrot.slane %v266_v21, %v269_v20 }
  0xdb   : > { %272 = vbcast.lane.b32.xlu0 %v270_v22, 256 }
 0x14d   : > { %v273_v24 = vpop.permute.xlu0 %272 }
 0x14e   : > { %v274_v25 = vmul.f32 %v273_v24, %v253_v23 }
 0x150   : > { %v276_v26 = vsel %vm275_vm2, %v274_v25, 0.0 }
 0x151   : > { %v277_v27 = vrot.slane %v276_v26, 4 }
 0x153   : > { %v278_v28 = vadd.f32 %v277_v27, %v276_v26 }
 0x155   : > { %v279_v29 = vrot.slane %v278_v28, 2 }
 0x157   : > { %v280_v30 = vadd.f32 %v279_v29, %v278_v28 }
 0x159   : > { %v281_v31 = vrot.slane %v280_v30, 1 }
 0x15b   : > { %v282_v33 = vadd.f32 %v281_v31, %v280_v30 }
 0x15d   : > { %v283_v34 = vadd.f32 %v282_v33, %v255_v32 }
 0x15f   : > { %v284_v35 = vadd.f32 3.0, %v283_v34 }
 0x161   : > { %v285_v36 = vmax.f32 %v284_v35, 0.0 }
 0x163   : > { %v286_v37 = vmin.f32 %v285_v36, 6.0 }
 0x165   : > { %v287_v38 = vmul.f32 0.16666667, %v286_v37 }
 0x167   : > { %v291_v39 = vrot.slane %v287_v38, %v269_v20 }
 0x169   : > { %293 = vbcast.lane.b32.xlu1 %v291_v39, 256 }
 0x1db   : > { %v294_v44 = vpop.permute.xlu1 %293 }
 0x1dc   : > { %v302_v45 = vrot.slane %v294_v44, %v301_v43 }
 0x1de   : > { %v304_v46 = vmul.f32 %v302_v45, %v241_v0 }
 0x1e0   : > { %305 = vst [vmem:[%s240_s9] sm:$0xff] %v304_v46 }
 0x1e1   : > { %496 = shalt.err (!%p493_p10)
}
 0x1e2   : > { %s497_s17 = scalar_lea.hbm %s319_s15, 128  ;;  %s501_s26 = scalar_lea.hbm %s744_s5, 256 }
 0x1e3   : > { %p498_p2 = scmp.ne.s32.totalorder %s319_s15, %s497_s17  ;;  %p502_p7 = scmp.lt.s32.totalorder %s319_s15, %s744_s5 }
 0x1e4   : > { %p503_p0 = scmp.lt.s32.totalorder %s501_s26, %s497_s17 }
 0x1e5   : > { %p499_p4 = pnand %p498_p2, %p755_p12 }
 0x1e6   : > { %p504_p6 = por %p503_p0, %p502_p7 }
 0x1e7   : > { %p500_p9 = pneg %p499_p4 }
 0x1e9   : > { %p505_p11 = pnand %p504_p6, %p500_p9 }
 0x1eb   : > { %508 = shalt.err (!%p505_p11)
}
 0x1ec   : > { %409 = dma.vmem_to_hbm [thread:$0]  (%p755_p12), %s322_s10, 128, %s319_s15, %s307_s12  }
 0x1ed PF: > { %s333_s7 = sand.u32 1, %s535_s18   ;;  %p756_p13 = scmp.ne.s32.totalorder %s750_s6, 0 }
 0x1ee   : > { %p757_p1 = scmp.ge.s32.totalorder %s547_s21, 2  ;;  %s334_s9 = scalar_lea.sflag [#allocation4], %s333_s7 }
 0x1f0   : > { %p416_p3 = pnand %p757_p1, %p756_p13 }
 0x1f2   : > { %p417_p5 = pneg %p416_p3 }
 0x1f4   : > { %530 = dma.done.wait (%p417_p5), %s334_s9, 128  }
 0x1f5   : > { %532 = vsyncadd (%p417_p5), %s334_s9, 4294967168  ;;  %p18_p8 = scmp.ge.s32.totalorder %s607_s24, 4   ;;  %s758_s18 = smov %s539_s19 }
 0x1f6   : > { %s759_s19 = smov %s543_s20  ;;  %s760_s20 = smov %s619_s27 }
 0x1f7   : > { %s761_s21 = smov %s607_s24  ;;  %20 = sbr.rel (!%p18_p8) target bundleno = 5 (0x5), region = 85 }
 0x1fc   :  { %339 = vsyncpa [#allocation3], 1 }
 0x1fd   :  { %341 = vsyncpa [#allocation3 + $0x1], 1 }
 0x1fe   :  { %342 = vsyncpa [#allocation4], 1 }
 0x1ff   :  { %344 = vsyncpa [#allocation4 + $0x1], 1 }

</bundles_post_ra>
